<compile_context>
chip_gen: v6e
topology: v6e:2x2x1
jax: 0.10.0
libtpu: 0.0.40
codegen_flags: <defaults>
</compile_context>

<pallas_src>
import functools

import jax
import jax.numpy as jnp
from jax.experimental import pallas as pl
from jax.experimental.pallas import tpu as pltpu


def _round_up(n, m):
    return ((n + m - 1) // m) * m


def _nc1_loss_kernel(x_ref, labels_ref, means_ref, n_ref, out_ref,
                     mu_buf, mu_sem, csum_ref, cnt_ref, *,
                     num_classes, batch_size, matmul_dtype, approx_recip):
    """One batch tile per grid step; finalize on the last step.

    x_ref      : (TB, D)    streamed batch tile, native dtype (unpadded D)
    labels_ref : (1, TB)    i32 streamed label tile (padded entries = -1)
    means_ref  : (Cpad, D)  raw (pl.ANY / HBM) ref, DMA'd once into mu_buf
    n_ref      : (Cpad, 1)  f32 resident per-class occurrence counts
    out_ref    : (1, 1)     f32 SMEM scalar loss
    mu_buf     : (Cpad, D)  f32 VMEM scratch holding the class means
    mu_sem     : DMA semaphore for the single means copy
    csum_ref   : (Cpad, D)  f32 scratch: per-class sum of normalized features
    cnt_ref    : (Cpad, 1)  f32 scratch: per-class row counts
    """
    i = pl.program_id(0)
    last = pl.num_programs(0) - 1
    tb = x_ref.shape[0]
    c_pad = csum_ref.shape[0]

    @pl.when(i == 0)
    def _init():
        csum_ref[...] = jnp.zeros_like(csum_ref)
        cnt_ref[...] = jnp.zeros_like(cnt_ref)
        # means are only needed at finalize: issue a single DMA now so it is
        # fully hidden behind the batch reduction and only one (non-double-
        # buffered) VMEM copy of the means is ever alive.
        pltpu.make_async_copy(means_ref, mu_buf, mu_sem).start()

    x = x_ref[...].astype(jnp.float32)
    if batch_size % tb != 0:
        # Partial last tile: out-of-bounds rows of the block contain garbage
        # (possibly NaN/Inf) -> select (not multiply) them to exact zero.
        row_ids = jax.lax.broadcasted_iota(jnp.int32, (tb, 1), 0) + i * tb
        x = jnp.where(row_ids < batch_size, x, 0.0)

    # Row-wise L2 normalization (torch: x / (||x|| + 1e-10)); the approximate
    # reciprocal runs on the otherwise-idle EUP slot.
    inv_norm = pl.reciprocal(
        jnp.sqrt(jnp.sum(x * x, axis=1, keepdims=True)) + 1e-10,
        approx=approx_recip)
    x_norm = x * inv_norm                                        # (TB, D) f32

    # Transposed one-hot mask: mask_t[c, b] = (labels[b] == c).
    labels = labels_ref[...]                                     # (1, TB) i32
    class_ids = jax.lax.broadcasted_iota(jnp.int32, (c_pad, tb), 0)
    mask_t = (class_ids == labels).astype(jnp.float32)           # (Cpad, TB)

    # Per-class feature sums on the MXU (bf16 operands exactly represent the
    # 0/1 mask; f32 accumulation) and per-class counts on the XLU.  No (B, C)
    # distmat is ever materialized.
    csum_ref[...] += jax.lax.dot_general(
        mask_t.astype(matmul_dtype), x_norm.astype(matmul_dtype),
        dimension_numbers=(((1,), (0,)), ((), ())),
        preferred_element_type=jnp.float32)                      # (Cpad, D)
    cnt_ref[...] += jnp.sum(mask_t, axis=1, keepdims=True)       # (Cpad, 1)

    @pl.when(i == last)
    def _finalize():
        pltpu.make_async_copy(means_ref, mu_buf, mu_sem).wait()
        # Normalize means exactly once.
        mu = mu_buf[...].astype(jnp.float32)
        mu_inv = pl.reciprocal(
            jnp.sqrt(jnp.sum(mu * mu, axis=1, keepdims=True)) + 1e-10,
            approx=False)
        mu_norm = mu * mu_inv                                    # (Cpad, D)

        # D[c] = sum_{b: label==c} (1 - cos_sim(x_b, mu_c))
        #      = count[c] - <csum[c, :], mu_norm[c, :]>
        sim_sum = jnp.sum(csum_ref[...] * mu_norm, axis=1, keepdims=True)
        n = n_ref[...]                                           # (Cpad, 1)
        present = (n > 0.0).astype(jnp.float32)                  # mask2
        d = (cnt_ref[...] - sim_sum) * present                   # (Cpad, 1)

        inv_sqrt_n = pl.reciprocal(jnp.sqrt(n) + 1e-10, approx=False)
        ratio = jnp.clip(d * inv_sqrt_n, 1e-12, 1e12)            # (Cpad, 1)

        # Exclude padded classes; real classes (incl. N[c]==0, which clip to
        # 1e-12) keep torch semantics.
        valid = (jax.lax.broadcasted_iota(jnp.int32, ratio.shape, 0)
                 < num_classes).astype(jnp.float32)
        out_ref[0, 0] = jnp.sum(ratio * valid) / jnp.float32(num_classes)


def nc1_loss_v5_cosine(x, means, labels, occurrences, *, block_b=None,
                       matmul_dtype=jnp.bfloat16, approx_recip=True):
    """
    Args:
      x:           (B, D) features (any float dtype; streamed in native dtype)
      means:       (C, D) class means (the module's nn.Parameter)
      labels:      (B,)   integer ground-truth labels
      occurrences: (C,)   per-class occurrence counts (self.N)
      block_b:     optional batch tile size (rows per grid step)
      matmul_dtype: MXU operand dtype for the accumulation matmul
      approx_recip: EUP approximate reciprocal for the per-row normalization
    Returns:
      (loss_scalar, means) mirroring the torch module's return tuple.
    """
    B, D = x.shape
    C, Dm = means.shape
    assert Dm == D
    itemsize = jnp.dtype(x.dtype).itemsize
    c_pad = _round_up(C, 8)            # sublane alignment for class-side arrays
    d128 = _round_up(D, 128)           # only used for conservative VMEM estimates

    # ---- batch tile: target a few MiB per streamed x buffer ----------------
    if block_b is None:
        target_bytes = 4 * 2**20
        block_b = int(min(max(512, target_bytes // max(D * itemsize, 1)), 4096))
    if B <= block_b:
        tb = _round_up(B, 8)           # single tile (no %128 constraint on labels)
    else:
        tb = _round_up(block_b, 128)   # multi-tile: label block last dim must be %128

    # ---- generation-aware VMEM budget --------------------------------------
    try:
        vmem_cap = int(pltpu.get_tpu_info().vmem_capacity_bytes)
    except Exception:
        vmem_cap = 64 * 2**20          # conservative fallback (safe on v7x)
    headroom = 8 * 2**20

    def est_vmem(tb_):
        tb128 = _round_up(tb_, 128)
        return (2 * tb_ * D * itemsize          # streamed x (double buffered)
                + 2 * tb128 * 4                 # streamed labels
                + 2 * c_pad * 128 * 4           # resident N (double buffered)
                + c_pad * d128 * 4              # mu_buf scratch (single buffer)
                + c_pad * d128 * 4              # csum scratch
                + c_pad * 128 * 4               # cnt scratch
                + tb_ * d128 * 4                # x_norm f32 working set
                + c_pad * tb128 * 4             # mask_t working set
                + c_pad * d128 * 4)             # matmul result tile

    while tb > 128 and est_vmem(tb) > vmem_cap - headroom:
        tb = max(128, _round_up(tb // 2, 128))
    # TODO(synk): also tile D when a single (128, D) slab still exceeds VMEM.

    num_tiles = -(-B // tb)            # ceil div
    b_pad = num_tiles * tb

    # Only small arrays are padded on the host: labels (-1 for tail rows),
    # means/N along the class axis (zero rows -> N=0 -> masked at finalize).
    labels_p = jnp.full((1, b_pad), -1, jnp.int32).at[0, :B].set(
        labels.astype(jnp.int32))
    means_p = jnp.zeros((c_pad, D), jnp.float32).at[:C, :].set(
        means.astype(jnp.float32))
    n_p = jnp.zeros((c_pad, 1), jnp.float32).at[:C, 0].set(
        occurrences.astype(jnp.float32))

    vmem_limit = int(min(max(int(1.5 * est_vmem(tb)), 32 * 2**20),
                         vmem_cap - headroom))

    kernel = functools.partial(
        _nc1_loss_kernel, num_classes=C, batch_size=B,
        matmul_dtype=matmul_dtype, approx_recip=approx_recip)

    grid_spec = pltpu.PrefetchScalarGridSpec(
        num_scalar_prefetch=0,
        grid=(num_tiles,),
        in_specs=[
            pl.BlockSpec((tb, D), lambda i: (i, 0)),       # x: streamed, unpadded
            pl.BlockSpec((1, tb), lambda i: (0, i)),       # labels: streamed
            pl.BlockSpec(memory_space=pl.ANY),             # means: manual one-shot DMA
            pl.BlockSpec((c_pad, 1), lambda i: (0, 0)),    # N: resident (tiny)
        ],
        out_specs=pl.BlockSpec(memory_space=pltpu.SMEM),   # scalar loss
        scratch_shapes=[
            pltpu.VMEM((c_pad, D), jnp.float32),           # mu_buf
            pltpu.SemaphoreType.DMA,                       # mu_sem
            pltpu.VMEM((c_pad, D), jnp.float32),           # csum
            pltpu.VMEM((c_pad, 1), jnp.float32),           # cnt
        ],
    )

    loss = pl.pallas_call(
        kernel,
        out_shape=jax.ShapeDtypeStruct((1, 1), jnp.float32),
        grid_spec=grid_spec,
        compiler_params=pltpu.CompilerParams(
            dimension_semantics=("arbitrary",),   # batch axis is a reduction
            vmem_limit_bytes=vmem_limit,
        ),
    )(x, labels_p, means_p, n_p)

    return loss[0, 0], means


def _reference(x, means, labels, occurrences):
    # Pure-JAX reference mirroring the torch module.
    xf = x.astype(jnp.float32)
    x_n = xf / (jnp.linalg.norm(xf, axis=1, keepdims=True) + 1e-10)
    m_n = means / (jnp.linalg.norm(means, axis=1, keepdims=True) + 1e-10)
    distmat = 1.0 - x_n @ m_n.T
    C = means.shape[0]
    mask = (labels[:, None] == jnp.arange(C)[None, :]).astype(jnp.float32)
    mask2 = (occurrences[None, :] > 0).astype(jnp.float32)
    D = jnp.sum(distmat * mask * mask2, axis=0)
    N = occurrences.astype(jnp.float32) ** 0.5 + 1e-10
    return jnp.sum(jnp.clip(D / N, 1e-12, 1e12)) / C


if __name__ == "__main__":
    num_classes = 10
    feat_dim = 32
    batch = 8

    key = jax.random.PRNGKey(0)
    k_x, k_m, k_l = jax.random.split(key, 3)

    x = jax.random.normal(k_x, (batch, feat_dim), dtype=jnp.float32)
    # Deterministic init of self.means (nn.Parameter(torch.randn(C, D))).
    means = jax.random.normal(k_m, (num_classes, feat_dim), dtype=jnp.float32)
    labels = jax.random.randint(k_l, (batch,), 0, num_classes, dtype=jnp.int32)
    # Deterministic occurrence_list (self.N); includes a zero to exercise mask2.
    occurrences = jnp.array([5, 0, 3, 7, 2, 9, 1, 4, 6, 8], dtype=jnp.float32)

    # 1) Single-tile, strict math (f32 MXU, exact reciprocals): tight check.
    loss, means_out = nc1_loss_v5_cosine(
        x, means, labels, occurrences,
        matmul_dtype=jnp.float32, approx_recip=False)
    loss = jax.block_until_ready(loss)
    ref = _reference(x, means, labels, occurrences)
    assert jnp.allclose(loss, ref, rtol=1e-4, atol=1e-6), (loss, ref)
    assert means_out.shape == (num_classes, feat_dim)

    # 2) Multi-tile with a partial last tile (cross-tile accumulation + the
    #    in-kernel row-validity mask), strict math: tight check.
    batch2 = 300
    k2x, k2l = jax.random.split(jax.random.PRNGKey(1), 2)
    x2 = jax.random.normal(k2x, (batch2, feat_dim), dtype=jnp.float32)
    labels2 = jax.random.randint(k2l, (batch2,), 0, num_classes, dtype=jnp.int32)
    loss2, _ = nc1_loss_v5_cosine(
        x2, means, labels2, occurrences, block_b=128,
        matmul_dtype=jnp.float32, approx_recip=False)
    loss2 = jax.block_until_ready(loss2)
    ref2 = _reference(x2, means, labels2, occurrences)
    assert jnp.allclose(loss2, ref2, rtol=1e-4, atol=1e-6), (loss2, ref2)

    # 3) Default fast path: native bf16 streaming of x, bf16 MXU operands,
    #    approx reciprocal — looser tolerance.
    x2_bf16 = x2.astype(jnp.bfloat16)
    loss3, _ = nc1_loss_v5_cosine(x2_bf16, means, labels2, occurrences,
                                  block_b=128)
    loss3 = jax.block_until_ready(loss3)
    ref3 = _reference(x2_bf16, means, labels2, occurrences)
    assert jnp.allclose(loss3, ref3, rtol=2e-2, atol=1e-3), (loss3, ref3)

    print("KERNEL_OK")
</pallas_src>

<mosaic_0001>
module attributes {stable_mosaic.version = 11 : i64} {
  func.func @_nc1_loss_kernel(%arg0: i32, %arg1: memref<8x32xf32, #tpu.memory_space<vmem>>, %arg2: memref<1x8xi32, #tpu.memory_space<vmem>>, %arg3: memref<16x32xf32, #tpu.memory_space<any>>, %arg4: memref<16x1xf32, #tpu.memory_space<vmem>>, %arg5: memref<1x1xf32, #tpu.memory_space<smem>>, %arg6: memref<16x32xf32, #tpu.memory_space<vmem>>, %arg7: memref<!tpu.dma_semaphore, #tpu.memory_space<semaphore_mem>>, %arg8: memref<16x32xf32, #tpu.memory_space<vmem>>, %arg9: memref<16x1xf32, #tpu.memory_space<vmem>>) attributes {dimension_semantics = [#tpu.dimension_semantics<arbitrary>], iteration_bounds = array<i64: 1>, scalar_prefetch = 0 : i64, scratch_operands = 4 : i64, tpu.core_type = #tpu.core_type<tc>, window_params = [{transform_indices = @transform_0, window_bounds = array<i64: 8, 32>}, {transform_indices = @transform_1, window_bounds = array<i64: 1, 8>}, {}, {pipeline_mode = #tpu.pipeline_mode<synchronous>, transform_indices = @transform_3, window_bounds = array<i64: 16, 1>}, {transform_indices = @transform_4, window_bounds = array<i64: 1, 1>}]} {
    %c0_i32 = arith.constant 0 : i32
    %0 = arith.cmpi eq, %arg0, %c0_i32 : i32
    %1 = arith.extui %0 : i1 to i32
    %c0_i32_0 = arith.constant 0 : i32
    %2 = arith.cmpi ne, %1, %c0_i32_0 : i32
    scf.if %2 {
      %cst_17 = arith.constant 0.000000e+00 : f32
      %31 = vector.broadcast %cst_17 : f32 to vector<16x32xf32>
      %c0_18 = arith.constant 0 : index
      %c0_19 = arith.constant 0 : index
      %32 = vector.load %arg8[%c0_18, %c0_19] : memref<16x32xf32, #tpu.memory_space<vmem>>, vector<16x32xf32>
      tpu.vector_store %arg8[%c0_18, %c0_19], %31 {strides = array<i32>} : memref<16x32xf32, #tpu.memory_space<vmem>>, vector<16x32xf32>,
      %cst_20 = arith.constant 0.000000e+00 : f32
      %33 = vector.broadcast %cst_20 : f32 to vector<16x1xf32>
      %c0_21 = arith.constant 0 : index
      %c0_22 = arith.constant 0 : index
      %34 = vector.load %arg9[%c0_21, %c0_22] : memref<16x1xf32, #tpu.memory_space<vmem>>, vector<16x1xf32>
      tpu.vector_store %arg9[%c0_21, %c0_22], %33 {strides = array<i32>} : memref<16x1xf32, #tpu.memory_space<vmem>>, vector<16x1xf32>,
      tpu.enqueue_dma source(%arg3 : memref<16x32xf32, #tpu.memory_space<any>>) target(%arg6 : memref<16x32xf32, #tpu.memory_space<vmem>>) target_semaphore(%arg7 : memref<!tpu.dma_semaphore, #tpu.memory_space<semaphore_mem>>)
    } else {
    }
    %c0 = arith.constant 0 : index
    %c0_1 = arith.constant 0 : index
    %3 = vector.load %arg1[%c0, %c0_1] : memref<8x32xf32, #tpu.memory_space<vmem>>, vector<8x32xf32>
    %4 = arith.mulf %3, %3 : vector<8x32xf32>
    %cst = arith.constant dense<0.000000e+00> : vector<8xf32>
    %5 = vector.multi_reduction <add>, %4, %cst [1] : vector<8x32xf32> to vector<8xf32>
    %6 = vector.shape_cast %5 : vector<8xf32> to vector<8x1xf32>
    %7 = math.sqrt %6 : vector<8x1xf32>
    %cst_2 = arith.constant 1.000000e-10 : f32
    %8 = vector.broadcast %cst_2 : f32 to vector<8x1xf32>
    %9 = arith.addf %7, %8 : vector<8x1xf32>
    %10 = tpu.reciprocal %9 : vector<8x1xf32> -> vector<8x1xf32>
    %11 = vector.broadcast %10 : vector<8x1xf32> to vector<8x32xf32>
    %12 = arith.mulf %3, %11 : vector<8x32xf32>
    %c0_3 = arith.constant 0 : index
    %c0_4 = arith.constant 0 : index
    %13 = vector.load %arg2[%c0_3, %c0_4] : memref<1x8xi32, #tpu.memory_space<vmem>>, vector<1x8xi32>
    %14 = tpu.iota {dimensions = array<i32: 0>} : vector<16x8xi32>
    %15 = vector.broadcast %13 : vector<1x8xi32> to vector<16x8xi32>
    %16 = arith.cmpi eq, %14, %15 : vector<16x8xi32>
    %17 = arith.extui %16 : vector<16x8xi1> to vector<16x8xi32>
    %18 = arith.sitofp %17 : vector<16x8xi32> to vector<16x8xf32>
    %c0_5 = arith.constant 0 : index
    %c0_6 = arith.constant 0 : index
    %19 = vector.load %arg8[%c0_5, %c0_6] : memref<16x32xf32, #tpu.memory_space<vmem>>, vector<16x32xf32>
    %cst_7 = arith.constant dense<0.000000e+00> : vector<16x32xf32>
    %20 = tpu.matmul %18, %12, %cst_7 {dimension_numbers = #tpu.dot_dimension_numbers<[1], [0], [0], [1], [0, 0, 1, 1], [], []>} : vector<16x8xf32>, vector<8x32xf32>, vector<16x32xf32> -> vector<16x32xf32>
    %21 = arith.addf %19, %20 : vector<16x32xf32>
    %c0_8 = arith.constant 0 : index
    %c0_9 = arith.constant 0 : index
    %22 = vector.load %arg8[%c0_8, %c0_9] : memref<16x32xf32, #tpu.memory_space<vmem>>, vector<16x32xf32>
    tpu.vector_store %arg8[%c0_8, %c0_9], %21 {strides = array<i32>} : memref<16x32xf32, #tpu.memory_space<vmem>>, vector<16x32xf32>,
    %c0_10 = arith.constant 0 : index
    %c0_11 = arith.constant 0 : index
    %23 = vector.load %arg9[%c0_10, %c0_11] : memref<16x1xf32, #tpu.memory_space<vmem>>, vector<16x1xf32>
    %cst_12 = arith.constant dense<0.000000e+00> : vector<16xf32>
    %24 = vector.multi_reduction <add>, %18, %cst_12 [1] : vector<16x8xf32> to vector<16xf32>
    %25 = vector.shape_cast %24 : vector<16xf32> to vector<16x1xf32>
    %26 = arith.addf %23, %25 : vector<16x1xf32>
    %c0_13 = arith.constant 0 : index
    %c0_14 = arith.constant 0 : index
    %27 = vector.load %arg9[%c0_13, %c0_14] : memref<16x1xf32, #tpu.memory_space<vmem>>, vector<16x1xf32>
    tpu.vector_store %arg9[%c0_13, %c0_14], %26 {strides = array<i32>} : memref<16x1xf32, #tpu.memory_space<vmem>>, vector<16x1xf32>,
    %c0_i32_15 = arith.constant 0 : i32
    %28 = arith.cmpi eq, %arg0, %c0_i32_15 : i32
    %29 = arith.extui %28 : i1 to i32
    %c0_i32_16 = arith.constant 0 : i32
    %30 = arith.cmpi ne, %29, %c0_i32_16 : i32
    scf.if %30 {
      tpu.wait_dma2 semaphore(%arg7 : memref<!tpu.dma_semaphore, #tpu.memory_space<semaphore_mem>>) src(%arg3 : memref<16x32xf32, #tpu.memory_space<any>>) dst(%arg6 : memref<16x32xf32, #tpu.memory_space<vmem>>)
      %c0_17 = arith.constant 0 : index
      %c0_18 = arith.constant 0 : index
      %31 = vector.load %arg6[%c0_17, %c0_18] : memref<16x32xf32, #tpu.memory_space<vmem>>, vector<16x32xf32>
      %32 = arith.mulf %31, %31 : vector<16x32xf32>
      %cst_19 = arith.constant dense<0.000000e+00> : vector<16xf32>
      %33 = vector.multi_reduction <add>, %32, %cst_19 [1] : vector<16x32xf32> to vector<16xf32>
      %34 = vector.shape_cast %33 : vector<16xf32> to vector<16x1xf32>
      %35 = math.sqrt %34 : vector<16x1xf32>
      %cst_20 = arith.constant 1.000000e-10 : f32
      %36 = vector.broadcast %cst_20 : f32 to vector<16x1xf32>
      %37 = arith.addf %35, %36 : vector<16x1xf32>
      %38 = tpu.reciprocal %37 : vector<16x1xf32> -> vector<16x1xf32>
      %39 = vector.broadcast %38 : vector<16x1xf32> to vector<16x32xf32>
      %40 = arith.mulf %31, %39 : vector<16x32xf32>
      %c0_21 = arith.constant 0 : index
      %c0_22 = arith.constant 0 : index
      %41 = vector.load %arg8[%c0_21, %c0_22] : memref<16x32xf32, #tpu.memory_space<vmem>>, vector<16x32xf32>
      %42 = arith.mulf %41, %40 : vector<16x32xf32>
      %cst_23 = arith.constant dense<0.000000e+00> : vector<16xf32>
      %43 = vector.multi_reduction <add>, %42, %cst_23 [1] : vector<16x32xf32> to vector<16xf32>
      %44 = vector.shape_cast %43 : vector<16xf32> to vector<16x1xf32>
      %c0_24 = arith.constant 0 : index
      %c0_25 = arith.constant 0 : index
      %45 = vector.load %arg4[%c0_24, %c0_25] : memref<16x1xf32, #tpu.memory_space<vmem>>, vector<16x1xf32>
      %cst_26 = arith.constant 0.000000e+00 : f32
      %46 = vector.broadcast %cst_26 : f32 to vector<16x1xf32>
      %47 = arith.cmpf ogt, %45, %46 : vector<16x1xf32>
      %48 = arith.extui %47 : vector<16x1xi1> to vector<16x1xi32>
      %49 = arith.sitofp %48 : vector<16x1xi32> to vector<16x1xf32>
      %c0_27 = arith.constant 0 : index
      %c0_28 = arith.constant 0 : index
      %50 = vector.load %arg9[%c0_27, %c0_28] : memref<16x1xf32, #tpu.memory_space<vmem>>, vector<16x1xf32>
      %51 = arith.subf %50, %44 : vector<16x1xf32>
      %52 = arith.mulf %51, %49 : vector<16x1xf32>
      %53 = math.sqrt %45 : vector<16x1xf32>
      %cst_29 = arith.constant 1.000000e-10 : f32
      %54 = vector.broadcast %cst_29 : f32 to vector<16x1xf32>
      %55 = arith.addf %53, %54 : vector<16x1xf32>
      %56 = tpu.reciprocal %55 : vector<16x1xf32> -> vector<16x1xf32>
      %57 = arith.mulf %52, %56 : vector<16x1xf32>
      %cst_30 = arith.constant 9.99999996E-13 : f32
      %cst_31 = arith.constant 9.99999995E+11 : f32
      %58 = vector.broadcast %cst_30 : f32 to vector<16x1xf32>
      %59 = arith.maximumf %58, %57 : vector<16x1xf32>
      %60 = vector.broadcast %cst_31 : f32 to vector<16x1xf32>
      %61 = arith.minimumf %60, %59 : vector<16x1xf32>
      %62 = tpu.iota {dimensions = array<i32: 0>} : vector<16x1xi32>
      %c10_i32 = arith.constant 10 : i32
      %63 = vector.broadcast %c10_i32 : i32 to vector<16x1xi32>
      %64 = arith.cmpi slt, %62, %63 : vector<16x1xi32>
      %65 = arith.extui %64 : vector<16x1xi1> to vector<16x1xi32>
      %66 = arith.sitofp %65 : vector<16x1xi32> to vector<16x1xf32>
      %67 = arith.mulf %61, %66 : vector<16x1xf32>
      %68 = vector.shape_cast %67 : vector<16x1xf32> to vector<1x16x1xf32>
      %cst_32 = arith.constant dense<0.000000e+00> : vector<1xf32>
      %69 = vector.multi_reduction <add>, %68, %cst_32 [1, 2] : vector<1x16x1xf32> to vector<1xf32>
      %70 = vector.shape_cast %69 : vector<1xf32> to vector<1x1x1xf32>
      %71 = vector.extract %70[0, 0, 0] : f32 from vector<1x1x1xf32>
      %cst_33 = arith.constant 1.000000e+01 : f32
      %72 = arith.divf %71, %cst_33 : f32
      %c0_34 = arith.constant 0 : index
      %c0_35 = arith.constant 0 : index
      %73 = memref.load %arg5[%c0_34, %c0_35] : memref<1x1xf32, #tpu.memory_space<smem>>
      memref.store %72, %arg5[%c0_34, %c0_35] : memref<1x1xf32, #tpu.memory_space<smem>>
    } else {
    }
    return
  }
  func.func @transform_0(%arg0: i32) -> (i32, i32) {
    %c0_i32 = arith.constant 0 : i32
    %c0_i32_0 = arith.constant 0 : i32
    return %arg0, %c0_i32 : i32, i32
  }
  func.func @transform_1(%arg0: i32) -> (i32, i32) {
    %c0_i32 = arith.constant 0 : i32
    %c0_i32_0 = arith.constant 0 : i32
    return %c0_i32, %arg0 : i32, i32
  }
  func.func @transform_3(%arg0: i32) -> (i32, i32) {
    %c0_i32 = arith.constant 0 : i32
    %c0_i32_0 = arith.constant 0 : i32
    %c0_i32_1 = arith.constant 0 : i32
    return %c0_i32, %c0_i32_0 : i32, i32
  }
  func.func @transform_4(%arg0: i32) -> (i32, i32) {
    %c0_i32 = arith.constant 0 : i32
    %c0_i32_0 = arith.constant 0 : i32
    %c0_i32_1 = arith.constant 0 : i32
    return %c0_i32, %c0_i32_0 : i32, i32
  }
}

</mosaic_0001>

<bundles_post_ra>
// kernel: tpu_custom_call.1
= control target key start
LH: loop header
LB: loop body
LE: loop exit
PB: predicated region body
PF: predicated region fallthrough
CT: control target
= control target key end

     0   :  { %9 = vsyncpa [#allocation7], 0  ;;  %s518_s0 = inlined_call_operand.hbm [shape: f32[8,32], index: 0, kind: input, shape index: {}]   ;;  %s519_s1 = inlined_call_operand.vmem [shape: s32[1,8], index: 1, kind: input, shape index: {}]   ;;  %s520_s2 = inlined_call_operand.vmem [shape: f32[16,32], index: 2, kind: input, shape index: {}]   ;;  %s521_s3 = inlined_call_operand.vmem [shape: f32[16,1], index: 3, kind: input, shape index: {}]   ;;  %s522_s4 = inlined_call_operand.hbm [shape: f32[1,1], index: 4, kind: output, shape index: {}]  }
   0x1   :  { %10 = vsyncpa [#allocation8], 0  ;;  %s427_s15 = smov [#allocation6]  }
   0x2   :  { %s17_s16 = sshll.u32 %s427_s15, 4  ;;  %s18_s16 = int_to_ptr.vmem [resolvable:$true] %s17_s16 }
   0x3   :  { %s401_s17 = scalar_lea.vmem %s18_s16, 128  ;;  %p406_p1 = scmp.lt.s32.totalorder %s18_s16, %s18_s16 }
   0x4   :  { %p402_p0 = scmp.ne.s32.totalorder %s18_s16, %s401_s17  ;;  %p407_p2 = scmp.lt.s32.totalorder %s401_s17, %s401_s17 }
   0x6   :  { %p408_p3 = por %p407_p2, %p406_p1 }
   0x8   :  { %p409_p4 = pnand %p408_p3, %p402_p0 }
   0xa   :  { %412 = shalt.err (!%p409_p4)
}
   0xb   :  { %20 = dma.hbm_to_vmem [thread:$0]  %s518_s0, 128, %s18_s16, [#allocation7]  }
   0xc   :  { %421 = dma.done.wait [#allocation7], 128  }
   0xd   :  { %422 = vsyncadd [#allocation7], 4294967168  ;;  %vm32_vm0 = vcmask 261120   ;;  %vm35_vm1 = vcmask 7168   ;;  %v428_v0 = vmov 0.0   ;;  %v469_v1 = vld [vmem:[%s520_s2] sm:$0xff] }
   0xe   :  { %33 = vst.msk [vmem:[#allocation4] sm:$0xff] %vm32_vm0, %v428_v0  ;;  %34 = vst.msk [vmem:[#allocation4 + $0x8] sm:$0xff] %vm32_vm0, %v428_v0  ;;  %v474_v2 = vld [vmem:[%s520_s2 + $0x8] sm:$0xff]  ;;  %v83_v3 = vld [vmem:[#allocation6] sm:$0xff] }
   0xf   :  { %36 = vst.msk [vmem:[#allocation5] sm:$0xff] %vm35_vm1, %v428_v0  ;;  %37 = vst.msk [vmem:[#allocation5 + $0x8] sm:$0xff] %vm35_vm1, %v428_v0 }
  0x10   :  { %82 = vsyncadd [#allocation3], 256  ;;  %v84_v4 = vmul.f32 %v83_v3, %v83_v3  ;;  %v100_v6 = vlaneseq  ;;  %v351_v8 = vld [vmem:[%s519_s1] ss:$0 sm:$0xff]  ;;  %vm115_vm4 = vcmask 64512   ;;  %v223_v35 = vmul.f32 %v474_v2, %v474_v2 }
  0x11   :  { %v222_v36 = vmul.f32 %v469_v1, %v469_v1 }
  0x12   :  { %v86_v5 = vsel %vm32_vm0, %v84_v4, 0.0  ;;  %v101_v7 = vshrl.u32 %v100_v6, 7 }
  0x13   :  { %87 = vadd.xlane.f32.xlu0 %v86_v5 }
  0x14   :  { %v480_v9 = vadd.s32 8, %v101_v7  ;;  %vm107_vm2 = vcmp.eq.s32.totalorder %v101_v7, %v351_v8 }
  0x15   :  { %v352_v10 = vsel %vm107_vm2, 1.0, %v428_v0  ;;  %v114_v29 = vld [vmem:[#allocation4 + $0x8] sm:$0xff]  ;;  %v113_v31 = vld [vmem:[#allocation4] sm:$0xff] }
  0x16   :  { %vm108_vm3 = vcmp.eq.s32.totalorder %v480_v9, %v351_v8  ;;  %365 = vmatprep.mubr.msk.f32.mxu0 %vm115_vm4, %v352_v10  ;;  %v203_v13 = vsel %vm115_vm4, %v352_v10, 0.0  ;;  %v202_v23 = vld [vmem:[#allocation5 + $0x8] sm:$0xff]  ;;  %v201_v25 = vld [vmem:[#allocation5] sm:$0xff] }
  0x17   :  { %v353_v11 = vsel %vm108_vm3, 1.0, %v428_v0  ;;  %204 = vadd.xlane.f32.xlu0 %v203_v13 }
  0x18   :  { %v206_v12 = vsel %vm115_vm4, %v353_v11, 0.0 }
  0x19   :  { %207 = vadd.xlane.f32.xlu1 %v206_v12 }
  0x9c   :  { %v88_v14 = vpop.xlane.xlu0 %87 }
  0x9d   :  { %373 = vrsqrt.f32 %v88_v14  ;;  %vm91_vm5 = vcmp.eq.f32.partialorder %v88_v14, inf  ;;  %v94_v17 = vand.u32 2147483648, %v88_v14  ;;  %vm93_vm6 = vcmp.eq.f32.partialorder %v88_v14, 0.0 }
  0xa0   :  { %v205_v26 = vpop.xlane.xlu0 %204 }
  0xa1   :  { %v209_v28 = vadd.f32 %v205_v26, %v201_v25 }
  0xa2   :  { %v208_v24 = vpop.xlane.xlu1 %207 }
  0xa3   :  { %v210_v27 = vadd.f32 %v208_v24, %v202_v23  ;;  %212 = vst.msk [vmem:[#allocation5] sm:$0xff] %vm35_vm1, %v209_v28 }
  0xa5   :  { %213 = vst.msk [vmem:[#allocation5 + $0x8] sm:$0xff] %vm35_vm1, %v210_v27 }
  0xaa   :  { %v374_v15 = vpop.eup %373 }
  0xab   :  { %v90_v16 = vmul.f32 %v374_v15, %v88_v14 }
  0xad   :  { %v92_v18 = vsel %vm91_vm5, %v88_v14, %v90_v16 }
  0xae   :  { %v95_v19 = vsel %vm93_vm6, %v94_v17, %v92_v18 }
  0xaf   :  { %v96_v20 = vadd.f32 1e-10, %v95_v19 }
  0xb1   :  { %375 = vrcp.f32 %v96_v20 }
  0xbe   :  { %v376_v21 = vpop.eup %375 }
  0xbf   :  { %v98_v22 = vmul.f32 %v376_v21, %v83_v3 }
  0xc1   :  { %363 = vmatprep.subr.mxu0 %v98_v22 }
  0xc2   :  { %364 = vmatpush3.msra.mxu0 %v98_v22 }
  0xc3   :  { %366 = vmatmul.mubr.msk.f32.vlgmr.msra.gmra.mxu0 %vm115_vm4, %v353_v11 }
 0x183   :  { %v367_v30 = vpop.f32.mrf.mxu0 }
 0x184   :  { %v198_v32 = vadd.f32 %v367_v30, %v114_v29 }
 0x185   :  { %v188_v33 = vpop.f32.mrf.mxu0 }
 0x186   :  { %200 = vst.msk [vmem:[#allocation4 + $0x8] sm:$0xff] %vm32_vm0, %v198_v32  ;;  %v197_v34 = vadd.f32 %v188_v33, %v113_v31 }
 0x188   :  { %199 = vst.msk [vmem:[#allocation4] sm:$0xff] %vm32_vm0, %v197_v34 }
 0x189   :  { %423 = dma.done.wait [#allocation3], 256 }
 0x18a   :  { %424 = vsyncadd [#allocation3], 4294967040  ;;  %v227_v37 = vsel %vm32_vm0, %v223_v35, 0.0  ;;  %v224_v38 = vsel %vm32_vm0, %v222_v36, 0.0  ;;  %v261_v63 = vld [vmem:[%s521_s3 + $0x8] sm:$0xff]  ;;  %v269_v15 = vld [vmem:[#allocation5 + $0x8] sm:$0xff] }
 0x18b   :  { %228 = vadd.xlane.f32.xlu0 %v227_v37  ;;  %vm283_vm11 = vcmp.eq.f32.partialorder %v261_v63, inf  ;;  %vm285_vm12 = vcmp.eq.f32.partialorder %v261_v63, 0.0  ;;  %vm263_vm15 = vcmp.gt.f32.partialorder %v261_v63, 0.0  ;;  %v268_v20 = vld [vmem:[#allocation5] sm:$0xff]  ;;  %vm299_vm2 = vcmp.lt.s32.totalorder %v480_v9, 10  ;;  %s429_s28 = smov [#allocation9]  }
 0x18c   :  { %v357_v16 = vsel %vm263_vm15, 1.0, %v428_v0  ;;  %v358_v29 = vsel %vm299_vm2, 1.0, %v428_v0 }
 0x18d   :  { %v251_v54 = vld [vmem:[#allocation4 + $0x8] sm:$0xff] }
 0x18f   :  { %225 = vadd.xlane.f32.xlu0 %v224_v38  ;;  %v250_v58 = vld [vmem:[#allocation4] sm:$0xff] }
 0x214   :  { %v229_v39 = vpop.xlane.xlu0 %228 }
 0x215   :  { %377 = vrsqrt.f32 %v229_v39  ;;  %vm239_vm7 = vcmp.eq.f32.partialorder %v229_v39, inf  ;;  %v242_v43 = vand.u32 2147483648, %v229_v39  ;;  %vm241_vm8 = vcmp.eq.f32.partialorder %v229_v39, 0.0 }
 0x218   :  { %v226_v40 = vpop.xlane.xlu0 %225 }
 0x219   :  { %379 = vrsqrt.f32 %v226_v40  ;;  %vm232_vm9 = vcmp.eq.f32.partialorder %v226_v40, inf  ;;  %v235_v49 = vand.u32 2147483648, %v226_v40  ;;  %vm234_vm10 = vcmp.eq.f32.partialorder %v226_v40, 0.0 }
 0x222   :  { %v378_v41 = vpop.eup %377 }
 0x223   :  { %v238_v42 = vmul.f32 %v378_v41, %v229_v39 }
 0x225   :  { %v240_v44 = vsel %vm239_vm7, %v229_v39, %v238_v42 }
 0x226   :  { %v380_v45 = vpop.eup %379  ;;  %v243_v46 = vsel %vm241_vm8, %v242_v43, %v240_v44 }
 0x227   :  { %v231_v47 = vmul.f32 %v380_v45, %v226_v40  ;;  %v245_v48 = vadd.f32 1e-10, %v243_v46 }
 0x229   :  { %381 = vrcp.f32 %v245_v48  ;;  %v233_v50 = vsel %vm232_vm9, %v226_v40, %v231_v47 }
 0x22a   :  { %v236_v51 = vsel %vm234_vm10, %v235_v49, %v233_v50 }
 0x22b   :  { %v244_v52 = vadd.f32 1e-10, %v236_v51 }
 0x22d   :  { %383 = vrcp.f32 %v244_v52 }
 0x22e   :  { %385 = vrsqrt.f32 %v261_v63 }
 0x236   :  { %v382_v53 = vpop.eup %381 }
 0x237   :  { %v249_v55 = vmul.f32 %v382_v53, %v474_v2  ;;  %v260_v2 = vld [vmem:[%s521_s3] sm:$0xff] }
 0x238   :  { %387 = vrsqrt.f32 %v260_v2  ;;  %vm276_vm13 = vcmp.eq.f32.partialorder %v260_v2, inf  ;;  %v279_v10 = vand.u32 2147483648, %v260_v2  ;;  %vm278_vm14 = vcmp.eq.f32.partialorder %v260_v2, 0.0 }
 0x239   :  { %v253_v56 = vmul.f32 %v251_v54, %v249_v55 }
 0x23a   :  { %v384_v57 = vpop.eup %383 }
 0x23b   :  { %v257_v59 = vsel %vm32_vm0, %v253_v56, 0.0  ;;  %v248_v60 = vmul.f32 %v384_v57, %v469_v1  ;;  %v386_v3 = vpop.eup %385  ;;  %v286_v1 = vand.u32 2147483648, %v261_v63 }
 0x23c   :  { %258 = vadd.xlane.f32.xlu1 %v257_v59  ;;  %v282_v4 = vmul.f32 %v386_v3, %v261_v63 }
 0x23d   :  { %v252_v61 = vmul.f32 %v250_v58, %v248_v60 }
 0x23e   :  { %v284_v6 = vsel %vm283_vm11, %v261_v63, %v282_v4 }
 0x23f   :  { %v254_v62 = vsel %vm32_vm0, %v252_v61, 0.0  ;;  %v287_v8 = vsel %vm285_vm12, %v286_v1, %v284_v6  ;;  %vm262_vm0 = vcmp.gt.f32.partialorder %v260_v2, 0.0 }
 0x240   :  { %255 = vadd.xlane.f32.xlu1 %v254_v62  ;;  %v289_v12 = vadd.f32 1e-10, %v287_v8  ;;  %v356_v22 = vsel %vm262_vm0, 1.0, %v428_v0 }
 0x242   :  { %389 = vrcp.f32 %v289_v12 }
 0x245   :  { %v388_v5 = vpop.eup %387 }
 0x246   :  { %v275_v7 = vmul.f32 %v388_v5, %v260_v2 }
 0x248   :  { %v277_v11 = vsel %vm276_vm13, %v260_v2, %v275_v7 }
 0x249   :  { %v280_v13 = vsel %vm278_vm14, %v279_v10, %v277_v11 }
 0x24a   :  { %v288_v14 = vadd.f32 1e-10, %v280_v13 }
 0x24c   :  { %391 = vrcp.f32 %v288_v14 }
 0x24f   :  { %v390_v19 = vpop.eup %389 }
 0x259   :  { %v392_v26 = vpop.eup %391 }
 0x2c5   :  { %v259_v17 = vpop.xlane.xlu1 %258 }
 0x2c6   :  { %v271_v18 = vsub.f32 %v269_v15, %v259_v17 }
 0x2c8   :  { %v273_v21 = vmul.f32 %v357_v16, %v271_v18 }
 0x2c9   :  { %v256_v23 = vpop.xlane.xlu1 %255 }
 0x2ca   :  { %v293_v24 = vmul.f32 %v390_v19, %v273_v21  ;;  %v270_v25 = vsub.f32 %v268_v20, %v256_v23 }
 0x2cc   :  { %v295_v27 = vmax.f32 %v293_v24, 1e-12  ;;  %v272_v28 = vmul.f32 %v356_v22, %v270_v25 }
 0x2ce   :  { %v292_v30 = vmul.f32 %v392_v26, %v272_v28  ;;  %v297_v31 = vmin.f32 %v295_v27, 1e+12 }
 0x2d0   :  { %v294_v32 = vmax.f32 %v292_v30, 1e-12  ;;  %v305_v33 = vmul.f32 %v358_v29, %v297_v31 }
 0x2d2   :  { %v296_v34 = vmin.f32 %v294_v32, 1e+12  ;;  %v307_v36 = vsel %vm35_vm1, %v305_v33, 0.0 }
 0x2d4   :  { %v306_v35 = vsel %vm35_vm1, %v296_v34, 0.0 }
 0x2d5   :  { %v308_v37 = vadd.f32 %v307_v36, %v306_v35 }
 0x2d7   :  { %309 = vadd.xlane.f32.xlu0 %v308_v37 }
 0x360   :  { %v310_v38 = vpop.xlane.xlu0 %309 }
 0x361   :  { %v311_v39 = vrot.slane %v310_v38, 4 }
 0x363   :  { %v312_v40 = vadd.f32 %v311_v39, %v310_v38 }
 0x365   :  { %v313_v9 = vrot.slane %v312_v40, 2 }
 0x367   :  { %v314_v41 = vadd.f32 %v313_v9, %v312_v40 }
 0x369   :  { %v315_v42 = vrot.slane %v314_v41, 1 }
 0x36b   :  { %v316_v43 = vadd.f32 %v315_v42, %v314_v41 }
 0x36d   :  { %368 = vpush %v316_v43 }
 0x39e   :  { %s369_s3 = spop %368 }
 0x39f   :  { %s320_s27 = smul.f32 0.1, %s369_s3 }
 0x3a1   :  { %322 = sst [smem:[#allocation9]] %s320_s27 }
 0x3a2   :  { %330 = dma.smem_to_hbm %s429_s28, 16, %s522_s4, [#allocation8]  }
 0x3a3   :  { %425 = dma.done.wait [#allocation8], 16  }
 0x3a4   :  { %426 = vsyncadd [#allocation8], 4294967280 }
 0x3a5   :  { %334 = sfence }
 0x3a6   :  { %335 = vsyncpa [#allocation7], 1 }
 0x3a7   :  { %336 = vsyncpa [#allocation8], 1 }
 0x3a8   :  { %337 = vsyncmov [#allocation3] }
 0x3ab   :  { %s338_s5 = vpop.sfrf %337 }
 0x3ac   :  { %p359_p5 = scmp.ne.s32.totalorder %s338_s5, 0 }
 0x3ae   :  { %342 = shalt.err (%p359_p5)  }

</bundles_post_ra>
